<compile_context>
chip_gen: v6e
topology: v6e:2x2x1
jax: 0.10.0
libtpu: 0.0.40
codegen_flags: <defaults>
</compile_context>

<pallas_src>
import functools

import jax
import jax.numpy as jnp
from jax.experimental import pallas as pl
from jax.experimental.pallas import tpu as pltpu

_LANE = 128
_VMEM_BUDGET = 16 << 20   # per-grid-step block budget (double-buffered io + intermediates)
_VMEM_LIMIT = 32 << 20    # scoped VMEM limit (safe on v5e / v6e / v7x)


def _attn_kernel(tgt_ref, src_ref, wc_ref, attn_ref, *, matmul_dtype):
    # tgt_ref:  (bblk, idf, TQ)       slab of input.view(B, idf, queryL)
    # src_ref:  (bblk, sourceL, idf)  sourceT pre-transposed (conv1x1 hoisted to wrapper)
    # wc_ref:   (bblk, idf, TQ)       weighted context
    # attn_ref: (bblk, sourceL, TQ)   attention, already transposed (sourceL-major)
    bblk = tgt_ref.shape[0]

    def body(b, carry):
        tgt = tgt_ref[b]        # (idf, TQ)
        src_t = src_ref[b]      # (SL, idf)

        if matmul_dtype is not None:
            tgt_mm = tgt.astype(matmul_dtype)
            src_mm = src_t.astype(matmul_dtype)
        else:
            tgt_mm, src_mm = tgt, src_t

        # scores_t[s, q] = sum_i sourceT[i, s] * target[i, q]   -> (SL, TQ)
        scores_t = jax.lax.dot_general(
            src_mm, tgt_mm,
            dimension_numbers=(((1,), (0,)), ((), ())),
            preferred_element_type=jnp.float32)

        # TODO(synk): optional applyMask / masked_fill(mask, -inf) path not implemented
        # (the module's default mask=None path is what is reproduced here).

        # softmax over sourceL (axis 0) == torch dim=1 softmax on the (B*QL, SL) view
        m = jnp.max(scores_t, axis=0, keepdims=True)
        e = jnp.exp(scores_t - m)
        denom = jnp.sum(e, axis=0, keepdims=True)
        p = e / denom                                   # (SL, TQ) == attn^T, exact

        p_mm = p.astype(matmul_dtype) if matmul_dtype is not None else p

        # wc[i, q] = sum_s sourceT[i, s] * p[s, q]               -> (idf, TQ)
        wc = jax.lax.dot_general(
            src_mm, p_mm,
            dimension_numbers=(((0,), (0,)), ((), ())),
            preferred_element_type=jnp.float32)

        wc_ref[b] = wc.astype(wc_ref.dtype)
        attn_ref[b] = p.astype(attn_ref.dtype)
        return carry

    jax.lax.fori_loop(0, bblk, body, None, unroll=True)


def global_attention_general(x, context, conv_weight, *, tq=1024, matmul_dtype=None):
    """
    x:           (B, idf, ih, iw)  float32
    context:     (B, cdf, sourceL) float32
    conv_weight: (idf, cdf)        float32   (1x1 conv kernel, no bias)
    tq:          max queryL tile (rounded down to a multiple of 128)
    matmul_dtype: optional (e.g. jnp.bfloat16) cast for the two large MXU matmuls
                  (f32 accumulation); None keeps everything f32.
    returns (weightedContext (B, idf, ih, iw), attn (B, sourceL, ih, iw))
    """
    B, idf, ih, iw = x.shape
    Bc, cdf, sourceL = context.shape
    assert Bc == B
    queryL = ih * iw

    # target = input.view(B, idf, queryL); no transpose / pad / extra HBM copy.
    target = x.reshape(B, idf, queryL)

    # Hoist the tiny 1x1-conv channel matmul out of the kernel and hand the kernel
    # sourceT already transposed -> (B, sourceL, idf), lane-dense (idf on lanes).
    src_t = jnp.einsum("oc,bcl->blo", conv_weight, context,
                       precision=jax.lax.Precision.HIGHEST).astype(x.dtype)

    def _blk_bytes(t, nb):
        # f32 double-buffered blocks (target, sourceT, wc, attn) plus per-batch f32
        # intermediates (scores/e/p at SL x t each, wc accumulator at idf x t).
        io = nb * 4 * (idf * t + sourceL * idf + idf * t + sourceL * t)
        inter = nb * 4 * (3 * sourceL * t + idf * t)
        return 2 * io + inter

    # --- queryL tile: lane-aligned (multiple of 128) or the full extent -------------
    tq_cap = max(_LANE, (int(tq) // _LANE) * _LANE)
    if queryL % _LANE == 0:
        TQ = min(queryL, tq_cap)
    elif queryL < tq_cap:
        TQ = queryL          # full-extent tile: allowed regardless of divisibility
    else:
        TQ = tq_cap          # multiple of 128; ragged last tile is masked by Pallas
    while TQ > _LANE and TQ % _LANE == 0 and _blk_bytes(TQ, 1) > _VMEM_BUDGET:
        TQ -= _LANE
    n_ql = pl.cdiv(queryL, TQ)

    # --- batch block: amortize per-step overhead but keep >= 4 grid steps -----------
    min_steps = min(4, B * n_ql)
    bblk = 1
    for d in range(1, min(B, 8) + 1):
        if B % d:
            continue
        if (B // d) * n_ql < min_steps:
            continue
        if _blk_bytes(TQ, d) > _VMEM_BUDGET:
            continue
        bblk = d

    kernel = functools.partial(_attn_kernel, matmul_dtype=matmul_dtype)

    wc, attn_t = pl.pallas_call(
        kernel,
        out_shape=(
            jax.ShapeDtypeStruct((B, idf, queryL), x.dtype),
            jax.ShapeDtypeStruct((B, sourceL, queryL), x.dtype),
        ),
        grid_spec=pltpu.PrefetchScalarGridSpec(
            num_scalar_prefetch=0,
            grid=(B // bblk, n_ql),
            in_specs=[
                pl.BlockSpec((bblk, idf, TQ), lambda b, q: (b, 0, q)),
                pl.BlockSpec((bblk, sourceL, idf), lambda b, q: (b, 0, 0)),
            ],
            out_specs=[
                pl.BlockSpec((bblk, idf, TQ), lambda b, q: (b, 0, q)),
                pl.BlockSpec((bblk, sourceL, TQ), lambda b, q: (b, 0, q)),
            ],
        ),
        compiler_params=pltpu.CompilerParams(
            dimension_semantics=("parallel", "parallel"),
            vmem_limit_bytes=_VMEM_LIMIT),
    )(target, src_t)

    weighted_context = wc.reshape(B, idf, ih, iw)
    attn_out = attn_t.reshape(B, sourceL, ih, iw)
    return weighted_context, attn_out


def _reference(x, context, conv_weight):
    # pure-JAX reference mirroring the PyTorch code (HIGHEST precision matmuls so the
    # comparison is not polluted by XLA's default bf16 matmul demotion on TPU).
    hp = jax.lax.Precision.HIGHEST
    B, idf, ih, iw = x.shape
    _, cdf, sourceL = context.shape
    queryL = ih * iw
    target = x.reshape(B, idf, queryL)
    targetT = jnp.transpose(target, (0, 2, 1))
    sourceT = jnp.einsum("oc,bcl->bol", conv_weight, context, precision=hp)
    attn = jnp.einsum("bqi,bil->bql", targetT, sourceT, precision=hp)
    attn = jax.nn.softmax(attn, axis=-1)
    attnT = jnp.transpose(attn, (0, 2, 1))
    wc = jnp.einsum("bil,blq->biq", sourceT, attnT, precision=hp)
    return wc.reshape(B, idf, ih, iw), attnT.reshape(B, sourceL, ih, iw)


if __name__ == "__main__":
    configs = [
        # queryL = 16 < 128 -> single full-extent q tile (no padding anywhere)
        dict(B=2, idf=32, cdf=16, ih=4, iw=4, sourceL=8, tq=1024),
        # queryL = 256, tq=128 -> two lane-aligned q tiles, 4 grid steps
        dict(B=2, idf=64, cdf=32, ih=16, iw=16, sourceL=8, tq=128),
        # queryL = 144, tq=128 -> ragged last q tile handled by block masking
        dict(B=2, idf=48, cdf=24, ih=12, iw=12, sourceL=10, tq=128),
    ]

    key = jax.random.PRNGKey(0)
    for cfg in configs:
        key, kx, kc, kw = jax.random.split(key, 4)
        x = jax.random.normal(
            kx, (cfg["B"], cfg["idf"], cfg["ih"], cfg["iw"]), dtype=jnp.float32)
        context = jax.random.normal(
            kc, (cfg["B"], cfg["cdf"], cfg["sourceL"]), dtype=jnp.float32)
        conv_weight = 0.1 * jax.random.normal(
            kw, (cfg["idf"], cfg["cdf"]), dtype=jnp.float32)

        wc, attn = global_attention_general(x, context, conv_weight, tq=cfg["tq"])
        jax.block_until_ready((wc, attn))

        wc_ref, attn_ref = _reference(x, context, conv_weight)
        assert wc.shape == wc_ref.shape
        assert attn.shape == attn_ref.shape
        wc_err = float(jnp.max(jnp.abs(wc - wc_ref)))
        attn_err = float(jnp.max(jnp.abs(attn - attn_ref)))
        assert jnp.allclose(wc, wc_ref, atol=2e-3, rtol=2e-3), ("wc max abs err", wc_err)
        assert jnp.allclose(attn, attn_ref, atol=2e-3, rtol=2e-3), ("attn max abs err", attn_err)

    print("KERNEL_OK")
</pallas_src>

<mosaic_0001>
module attributes {stable_mosaic.version = 11 : i64} {
  func.func @_attn_kernel(%arg0: i32, %arg1: i32, %arg2: memref<1x32x16xf32, #tpu.memory_space<vmem>>, %arg3: memref<1x8x32xf32, #tpu.memory_space<vmem>>, %arg4: memref<1x32x16xf32, #tpu.memory_space<vmem>>, %arg5: memref<1x8x16xf32, #tpu.memory_space<vmem>>) attributes {dimension_semantics = [#tpu.dimension_semantics<parallel>, #tpu.dimension_semantics<parallel>], iteration_bounds = array<i64: 2, 1>, scalar_prefetch = 0 : i64, scratch_operands = 0 : i64, tpu.core_type = #tpu.core_type<tc>, window_params = [{transform_indices = @transform_0, window_bounds = array<i64: 1, 32, 16>}, {transform_indices = @transform_1, window_bounds = array<i64: 1, 8, 32>}, {transform_indices = @transform_2, window_bounds = array<i64: 1, 32, 16>}, {transform_indices = @transform_3, window_bounds = array<i64: 1, 8, 16>}]} {
    %c0_i32 = arith.constant 0 : i32
    %0 = arith.index_cast %c0_i32 : i32 to index
    %c0 = arith.constant 0 : index
    %c0_0 = arith.constant 0 : index
    %1 = vector.load %arg2[%0, %c0, %c0_0] : memref<1x32x16xf32, #tpu.memory_space<vmem>>, vector<1x32x16xf32>
    %2 = vector.shape_cast %1 : vector<1x32x16xf32> to vector<32x16xf32>
    %3 = arith.index_cast %c0_i32 : i32 to index
    %c0_1 = arith.constant 0 : index
    %c0_2 = arith.constant 0 : index
    %4 = vector.load %arg3[%3, %c0_1, %c0_2] : memref<1x8x32xf32, #tpu.memory_space<vmem>>, vector<1x8x32xf32>
    %5 = vector.shape_cast %4 : vector<1x8x32xf32> to vector<8x32xf32>
    %cst = arith.constant dense<0.000000e+00> : vector<8x16xf32>
    %6 = tpu.matmul %5, %2, %cst {dimension_numbers = #tpu.dot_dimension_numbers<[1], [0], [0], [1], [0, 0, 1, 1], [], []>} : vector<8x32xf32>, vector<32x16xf32>, vector<8x16xf32> -> vector<8x16xf32>
    %cst_3 = arith.constant dense<0xFF800000> : vector<16xf32>
    %7 = vector.multi_reduction <maximumf>, %6, %cst_3 [0] : vector<8x16xf32> to vector<16xf32>
    %8 = vector.shape_cast %7 : vector<16xf32> to vector<1x16xf32>
    %9 = vector.broadcast %8 : vector<1x16xf32> to vector<8x16xf32>
    %10 = arith.subf %6, %9 : vector<8x16xf32>
    %11 = math.exp %10 : vector<8x16xf32>
    %cst_4 = arith.constant dense<0.000000e+00> : vector<16xf32>
    %12 = vector.multi_reduction <add>, %11, %cst_4 [0] : vector<8x16xf32> to vector<16xf32>
    %13 = vector.shape_cast %12 : vector<16xf32> to vector<1x16xf32>
    %14 = vector.broadcast %13 : vector<1x16xf32> to vector<8x16xf32>
    %15 = arith.divf %11, %14 : vector<8x16xf32>
    %cst_5 = arith.constant dense<0.000000e+00> : vector<32x16xf32>
    %16 = tpu.matmul %5, %15, %cst_5 {dimension_numbers = #tpu.dot_dimension_numbers<[0], [0], [1], [1], [0, 1, 1, 1], [], []>} : vector<8x32xf32>, vector<8x16xf32>, vector<32x16xf32> -> vector<32x16xf32>
    %17 = arith.index_cast %c0_i32 : i32 to index
    %c0_6 = arith.constant 0 : index
    %c0_7 = arith.constant 0 : index
    %18 = vector.load %arg4[%17, %c0_6, %c0_7] : memref<1x32x16xf32, #tpu.memory_space<vmem>>, vector<1x32x16xf32>
    %19 = vector.shape_cast %18 : vector<1x32x16xf32> to vector<32x16xf32>
    %20 = vector.shape_cast %16 : vector<32x16xf32> to vector<1x32x16xf32>
    tpu.vector_store %arg4[%17, %c0_6, %c0_7], %20 {strides = array<i32>} : memref<1x32x16xf32, #tpu.memory_space<vmem>>, vector<1x32x16xf32>,
    %21 = arith.index_cast %c0_i32 : i32 to index
    %c0_8 = arith.constant 0 : index
    %c0_9 = arith.constant 0 : index
    %22 = vector.load %arg5[%21, %c0_8, %c0_9] : memref<1x8x16xf32, #tpu.memory_space<vmem>>, vector<1x8x16xf32>
    %23 = vector.shape_cast %22 : vector<1x8x16xf32> to vector<8x16xf32>
    %24 = vector.shape_cast %15 : vector<8x16xf32> to vector<1x8x16xf32>
    tpu.vector_store %arg5[%21, %c0_8, %c0_9], %24 {strides = array<i32>} : memref<1x8x16xf32, #tpu.memory_space<vmem>>, vector<1x8x16xf32>,
    %c1_i32 = arith.constant 1 : i32
    return
  }
  func.func @transform_0(%arg0: i32, %arg1: i32) -> (i32, i32, i32) {
    %c0_i32 = arith.constant 0 : i32
    %c0_i32_0 = arith.constant 0 : i32
    return %arg0, %c0_i32, %arg1 : i32, i32, i32
  }
  func.func @transform_1(%arg0: i32, %arg1: i32) -> (i32, i32, i32) {
    %c0_i32 = arith.constant 0 : i32
    %c0_i32_0 = arith.constant 0 : i32
    %c0_i32_1 = arith.constant 0 : i32
    return %arg0, %c0_i32, %c0_i32_0 : i32, i32, i32
  }
  func.func @transform_2(%arg0: i32, %arg1: i32) -> (i32, i32, i32) {
    %c0_i32 = arith.constant 0 : i32
    %c0_i32_0 = arith.constant 0 : i32
    return %arg0, %c0_i32, %arg1 : i32, i32, i32
  }
  func.func @transform_3(%arg0: i32, %arg1: i32) -> (i32, i32, i32) {
    %c0_i32 = arith.constant 0 : i32
    %c0_i32_0 = arith.constant 0 : i32
    return %arg0, %c0_i32, %arg1 : i32, i32, i32
  }
}

</mosaic_0001>

<bundles_post_ra>
// kernel: tpu_custom_call.1
= control target key start
LH: loop header
LB: loop body
LE: loop exit
PB: predicated region body
PF: predicated region fallthrough
CT: control target
= control target key end

     0   :  { %9 = vsyncpa [#allocation3], 0  ;;  %s951_s0 = inlined_call_operand.vmem [shape: f32[2,32,16], index: 0, kind: input, shape index: {}]   ;;  %s952_s1 = inlined_call_operand.vmem [shape: f32[2,8,32], index: 1, kind: input, shape index: {}]   ;;  %s953_s2 = inlined_call_operand.vmem [shape: f32[2,32,16], index: 2, kind: output, shape index: {0}]   ;;  %s954_s3 = inlined_call_operand.hbm [shape: f32[2,8,16], index: 3, kind: output, shape index: {1}]  }
   0x1   :  { %11 = vsyncpa [#allocation3 + $0x1], 0  ;;  %s827_s12 = smov 0   ;;  %s829_s13 = smov 0  }
   0x2   :  { %s831_s14 = smov 0   ;;  %s833_s15 = smov 0  }
   0x3   :  { %s835_s16 = smov 0   ;;  %s837_s17 = smov 0  }
   0x4 LB: > { %s614_s18 = sadd.s32 4294967295, %s802_s17   ;;  %s615_s19 = sadd.s32 4294967294, %s802_s17   ;;  %s802_s17 = sphi %s837_s17, %s17_s17   ;;  %s798_s16 = sphi %s835_s16, %s961_s16   ;;  %s794_s15 = sphi %s833_s15, %s960_s15   ;;  %s790_s14 = sphi %s831_s14, %s959_s14   ;;  %s786_s13 = sphi %s829_s13, %s958_s13   ;;  %s782_s12 = sphi %s827_s12, %s957_s12  }
   0x5   : > { %s29_s20 = sadd.s32 1, %s798_s16  ;;  %s120_s21 = sadd.s32 1, %s790_s14 }
   0x6   : > { %p31_p0 = scmp.ge.s32.totalorder %s29_s20, 2  ;;  %p130_p1 = scmp.ne.s32.totalorder %s790_s14, %s786_s13 }
   0x7   : > { %p131_p2 = scmp.eq.s32.totalorder %s614_s18, 1  ;;  %p136_p3 = scmp.ne.s32.totalorder %s786_s13, %s782_s12 }
   0x8   : > { %s963_s20 = smov (%p31_p0, %s29_s20), 0  ;;  %p137_p5 = scmp.eq.s32.totalorder %s615_s19, 1 }
   0x9   : > { %p867_p4 = por %p131_p2, %p130_p1  ;;  %s115_s23 = ssub.s32 %s798_s16, %s963_s20 }
   0xa   : > { %p618_p6 = scmp.ge.s32.totalorder %s802_s17, 1  ;;  %p118_p7 = scmp.eq.s32.totalorder %s115_s23, 0 }
   0xb   : > { %p874_p8 = por %p137_p5, %p136_p3  ;;  %p173_p9 = scmp.lt.s32.totalorder %s802_s17, 3 }
   0xc   : > { %s880_s25 = scalar_select %p118_p7, %s790_s14, %s120_s21  }
   0xd   : > { %p174_p10 = pnand %p618_p6, %p173_p9 }
   0xe   : > { %p212_p11 = scmp.lt.s32.totalorder (!%p174_p10), %s794_s15, 1  ;;  %s209_s8 = sand.u32 (!%p174_p10), 1, %s786_s13  }
   0xf   : > { %177 = sbr.rel (%p174_p10) target bundleno = 487 (0x1e7), region = 28  ;;  %s619_s9 = sshll.u32 (!%p174_p10), %s209_s8, 3 }
  0x10   : > { %s211_s10 = scalar_lea.vmem (!%p174_p10), [#allocation2], %s619_s9  ;;  %s631_s11 = sshll.u32 (!%p174_p10), %s794_s15, 7 }
  0x11   : > { %s492_s18 = sshll.u32 (!%p174_p10), %s211_s10, 4  ;;  %s490_s23 = scalar_lea.hbm (!%p174_p10), %s954_s3, %s631_s11  ;;  %s493_s18 = int_to_ptr.vmem [resolvable:$true] %s492_s18 }
  0x12   : > { %s726_s29 = scalar_lea.vmem (!%p174_p10), %s493_s18, 128  ;;  %s806_s30 = smov (!%p174_p10), [#allocation2]  }
  0x13   : > { %p727_p12 = scmp.ne.s32.totalorder (!%p174_p10), %s493_s18, %s726_s29 }
  0x14   : > { %v804_v0 = vmov 0.0   ;;  %vm805_vm0 = vmmov 0   ;;  %s884_s26 = scalar_select %p212_p11, %s794_s15, 1  ;;  %vm237_vm1 = vcmask 261120   ;;  %vm363_vm2 = vcmask 64512  }
  0x15   : > { %646 = vmatprep.subr.mxu0 %v804_v0  ;;  %654 = vmatprep.mubr.msk.f32.mxu0 %vm805_vm0, %v804_v0  ;;  %vm311_vm3 = vcmask 130048   ;;  %p728_p13 = pnand %p727_p12, %p867_p4 }
  0x16   : > { %s634_s27 = sshll.u32 %s884_s26, 5  ;;  %s622_s28 = sshll.u32 %s884_s26, 3 }
  0x17   : > { %s219_s4 = scalar_lea.vmem %s951_s0, %s634_s27  ;;  %s223_s7 = scalar_lea.vmem %s952_s1, %s622_s28 }
  0x18   : > { %v235_v1 = vld [vmem:[%s219_s4 + $0x18] sm:$0xff]  ;;  %v234_v2 = vld [vmem:[%s219_s4 + $0x10] sm:$0xff]  ;;  %v236_v3 = vld [vmem:[%s223_s7] sm:$0xff]  ;;  %s475_s28 = scalar_lea.sflag [#allocation3], %s209_s8  ;;  %p729_p0 = pneg %p728_p13 }
  0x19   : > { %647 = vmatpush3.msra.mxu0 %v235_v1  ;;  %v233_v4 = vld [vmem:[%s219_s4 + $0x8] sm:$0xff]  ;;  %331 = vxpose.xlu0.b32.start.end [1/1] (short) (narrow) %v236_v3, 32  ;;  %v232_v5 = vld [vmem:[%s219_s4] sm:$0xff]  ;;  %s730_s4 = sshll.u32 %s806_s30, 4  ;;  %s731_s4 = int_to_ptr.vmem [resolvable:$false] %s730_s4 }
  0x1a   : > { %648 = vmatprep.subr.mxu0 %v804_v0  ;;  %s732_s5 = scalar_lea.vmem %s731_s4, 256  ;;  %p733_p1 = scmp.lt.s32.totalorder %s493_s18, %s731_s4 }
  0x1b   : > { %649 = vmatpush3.msra.mxu0 %v234_v2  ;;  %p734_p2 = scmp.lt.s32.totalorder %s732_s5, %s726_s29 }
  0x1c   : > { %650 = vmatprep.subr.mxu0 %v804_v0 }
  0x1d   : > { %651 = vmatpush3.msra.mxu0 %v233_v4  ;;  %p735_p3 = por %p734_p2, %p733_p1 }
  0x1e   : > { %652 = vmatprep.subr.mxu0 %v804_v0 }
  0x1f   : > { %653 = vmatpush3.msra.mxu0 %v232_v5  ;;  %p736_p5 = pnand %p735_p3, %p729_p0 }
  0x20   : > { %655 = vmatmul.mubr.msk.f32.vlgmr.msra.gmra.mxu0 %vm237_vm1, %v236_v3 }
  0x95   : > { %v347_v6 = vpop.trf.xlu0 }
  0x96   : > { %659 = vmatprep.mubr.msk.f32.mxu1 %vm363_vm2, %v347_v6 }
  0x99   : > { %v348_v26 = vpop.trf.xlu0 }
  0x9d   : > { %v349_v28 = vpop.trf.xlu0 }
  0xa1   : > { %v350_v30 = vpop.trf.xlu0 }
  0xe0   : > { %v307_v7 = vpop.f32.mrf.mxu0 }
  0xe1   : > { %v312_v8 = vsel %vm311_vm3, %v307_v7, -inf }
  0xe2   : > { %v313_v9 = vrot.slane %v312_v8, 4  ;;  %v656_v10 = vpop.f32.mrf.mxu0 }
  0xe4   : > { %v314_v11 = vmax.f32 %v312_v8, %v313_v9 }
  0xe6   : > { %v315_v12 = vrot.slane %v314_v11, 2 }
  0xe8   : > { %v316_v13 = vmax.f32 %v314_v11, %v315_v12 }
  0xea   : > { %v317_v14 = vrot.slane %v316_v13, 1 }
  0xec   : > { %v318_v15 = vmax.f32 %v316_v13, %v317_v14 }
  0xee   : > { %v319_v16 = vsub.f32 %v307_v7, %v318_v15 }
  0xf0   : > { %v320_v17 = vmul.f32 1.442695, %v319_v16 }
  0xf2   : > { %722 = vpow2.f32 %v320_v17 }
  0xff   : > { %v723_v18 = vpop.eup %722 }
 0x100   : > { %v322_v19 = vsel %vm311_vm3, %v723_v18, 0.0 }
 0x101   : > { %v323_v20 = vrot.slane %v322_v19, 4 }
 0x103   : > { %v324_v21 = vadd.f32 %v323_v20, %v322_v19 }
 0x105   : > { %v325_v22 = vrot.slane %v324_v21, 2 }
 0x107   : > { %v326_v23 = vadd.f32 %v325_v22, %v324_v21 }
 0x109   : > { %v327_v24 = vrot.slane %v326_v23, 1 }
 0x10b   : > { %v328_v25 = vadd.f32 %v327_v24, %v326_v23 }
 0x10d   : > { %724 = vrcp.f32 %v328_v25 }
 0x11a   : > { %v725_v27 = vpop.eup %724 }
 0x11b   : > { %v330_v29 = vmul.f32 %v725_v27, %v723_v18 }
 0x11d   : > { %657 = vmatprep.subr.mxu1 %v330_v29  ;;  %465 = vst.msk [vmem:[%s211_s10] sm:$0xff] %vm311_vm3, %v330_v29 }
 0x11e   : > { %658 = vmatpush3.msra.mxu1 %v330_v29 }
 0x11f   : > { %660 = vmatmul.mubr.msk.f32.vlgmr.msra.gmra.mxu1 %vm363_vm2, %v348_v26 }
 0x120   : > { %662 = vmatprep.mubr.msk.f32.mxu1 %vm363_vm2, %v349_v28 }
 0x123   : > { %663 = vmatmul.mubr.msk.f32.gmra.mxu1 %vm363_vm2, %v350_v30 }
 0x124   : > { %739 = shalt.err (!%p736_p5)
}
 0x125   : > { %s740_s15 = scalar_lea.hbm %s490_s23, 128  ;;  %s744_s8 = scalar_lea.hbm %s954_s3, 256 }
 0x126   : > { %p741_p6 = scmp.ne.s32.totalorder %s490_s23, %s740_s15  ;;  %p745_p10 = scmp.lt.s32.totalorder %s490_s23, %s954_s3 }
 0x127   : > { %p746_p11 = scmp.lt.s32.totalorder %s744_s8, %s740_s15 }
 0x128   : > { %p742_p7 = pnand %p741_p6, %p867_p4 }
 0x129   : > { %p747_p12 = por %p746_p11, %p745_p10 }
 0x12a   : > { %p743_p9 = pneg %p742_p7 }
 0x12c   : > { %p748_p13 = pnand %p747_p12, %p743_p9 }
 0x12e   : > { %751 = shalt.err (!%p748_p13)
}
 0x12f   : > { %665 = dma.vmem_to_hbm [thread:$0]  (%p867_p4), %s493_s18, 128, %s490_s23, %s475_s28  }
 0x130   : > { %s231_s21 = scalar_lea.vmem %s953_s2, %s634_s27 }
 0x1df   : > { %v661_v31 = vpop.f32.mrf.mxu1 }
 0x1e0   : > { %462 = vst.msk [vmem:[%s231_s21 + $0x8] sm:$0xff] %vm311_vm3, %v661_v31 }
 0x1e1   : > { %v442_v32 = vpop.f32.mrf.mxu1 }
 0x1e2   : > { %461 = vst.msk [vmem:[%s231_s21] sm:$0xff] %vm311_vm3, %v442_v32 }
 0x1e3   : > { %v664_v33 = vpop.f32.mrf.mxu1 }
 0x1e4   : > { %464 = vst.msk [vmem:[%s231_s21 + $0x18] sm:$0xff] %vm311_vm3, %v664_v33 }
 0x1e5   : > { %v452_v34 = vpop.f32.mrf.mxu1 }
 0x1e6   : > { %463 = vst.msk [vmem:[%s231_s21 + $0x10] sm:$0xff] %vm311_vm3, %v452_v34 }
 0x1e7 PF: > { %p671_p4 = scmp.ge.s32.totalorder %s802_s17, 2  ;;  %s515_s22 = sand.u32 1, %s782_s12  }
 0x1e8   : > { %s516_s26 = scalar_lea.sflag [#allocation3], %s515_s22 }
 0x1e9   : > { %p668_p0 = pnand %p671_p4, %p874_p8 }
 0x1eb   : > { %p669_p1 = pneg %p668_p0 }
 0x1ed   : > { %777 = dma.done.wait (%p669_p1), %s516_s26, 128  }
 0x1ee   : > { %779 = vsyncadd (%p669_p1), %s516_s26, 4294967168  ;;  %s17_s17 = sadd.s32 1, %s802_s17   ;;  %s957_s12 = smov %s786_s13 }
 0x1ef   : > { %p14_p2 = scmp.ge.s32.totalorder %s17_s17, 4   ;;  %s958_s13 = smov %s790_s14 }
 0x1f0   : > { %s959_s14 = smov %s880_s25  ;;  %s960_s15 = smov %s798_s16 }
 0x1f1   : > { %s961_s16 = smov %s963_s20  ;;  %16 = sbr.rel (!%p14_p2) target bundleno = 4 (0x4), region = 78 }
 0x1f6   :  { %521 = vsyncpa [#allocation3], 1 }
 0x1f7   :  { %523 = vsyncpa [#allocation3 + $0x1], 1 }

</bundles_post_ra>
